<compile_context>
chip_gen: v5e
topology: v5e:2x2
jax: 0.10.0
libtpu: 0.0.40
codegen_flags: <defaults>
</compile_context>

<pallas_src>
import jax
import jax.numpy as jnp
from jax.experimental import pallas as pl
from jax.experimental.pallas import tpu as pltpu

HIDDEN = 32          # hidden_features
TM_MAX = 1024        # points (lanes) per grid step


def _round_up(a, b):
    return (a + b - 1) // b * b


def mlp_kernel(x_ref, w1_ref, b1_ref, w2_ref, b2_ref, w3_ref, b3_ref,
               w4_ref, b4_ref, out_ref):
    x = x_ref[...]                                           # (3, TM)

    h = jnp.dot(w1_ref[...], x, preferred_element_type=jnp.float32) + b1_ref[...]
    h = jnp.maximum(h, 0.0)                                  # (H, TM)

    h = jnp.dot(w2_ref[...], h, preferred_element_type=jnp.float32) + b2_ref[...]
    h = jnp.maximum(h, 0.0)                                  # (H, TM)

    h = jnp.dot(w3_ref[...], h, preferred_element_type=jnp.float32) + b3_ref[...]
    h = jnp.maximum(h, 0.0)                                  # (H, TM)

    o = jnp.dot(w4_ref[...], h, preferred_element_type=jnp.float32) + b4_ref[...]
    out_ref[...] = o.astype(out_ref.dtype)                   # (1, TM) lane-dense


def _choose_tile(n):
    """Large lane tiles to amortize the ~0.35us per-grid-step overhead, but
    keep at least 2 grid steps when N allows so v7x can use both TensorCores."""
    if n >= 2 * TM_MAX:
        return TM_MAX
    return max(128, _round_up(pl.cdiv(n, 2), 128))


def mlp_forward(coords, params):
    """coords: (N, 3) float32.  Returns (output (N, 1), coords) like the torch module."""
    (w1, b1), (w2, b2), (w3, b3), (w4, b4) = params
    n, in_feat = coords.shape
    assert in_feat == 3

    tm = _choose_tile(n)
    n_pad = _round_up(n, tm)
    grid = (n_pad // tm,)

    # Pad the tail with zeros (extra points are computed and sliced off).
    coords_p = coords if n_pad == n else jnp.pad(coords, ((0, n_pad - n), (0, 0)))
    coords_t = coords_p.T                                    # (3, n_pad), points in lanes

    # Weights / biases are tiny -> pass as full (untiled) blocks, VMEM-resident.
    def full_spec(shape):
        return pl.BlockSpec(shape, lambda i: (0, 0))

    out_t = pl.pallas_call(
        mlp_kernel,
        out_shape=jax.ShapeDtypeStruct((1, n_pad), coords.dtype),
        grid_spec=pltpu.PrefetchScalarGridSpec(
            num_scalar_prefetch=0,
            grid=grid,
            in_specs=[
                pl.BlockSpec((3, tm), lambda i: (0, i)),     # coords tile (lane-dense)
                full_spec(w1.shape), full_spec(b1.shape),
                full_spec(w2.shape), full_spec(b2.shape),
                full_spec(w3.shape), full_spec(b3.shape),
                full_spec(w4.shape), full_spec(b4.shape),
            ],
            out_specs=pl.BlockSpec((1, tm), lambda i: (0, i)),
        ),
        compiler_params=pltpu.CompilerParams(
            dimension_semantics=("parallel",)),
    )(coords_t, w1, b1, w2, b2, w3, b3, w4, b4)

    out = out_t.T[:n]                                        # (N, 1)
    return out, coords


def init_params(key, h):
    """Deterministic init mimicking nn.Linear defaults (uniform +-1/sqrt(fan_in)).
    Weights are stored in torch layout (out_features, in_features); biases as
    (out_features, 1) columns for the points-in-lanes compute layout."""
    dims = [(3, h), (h, h), (h, h), (h, 1)]
    params = []
    for fan_in, fan_out in dims:
        key, kw, kb = jax.random.split(key, 3)
        bound = 1.0 / jnp.sqrt(jnp.float32(fan_in))
        w = jax.random.uniform(kw, (fan_out, fan_in), jnp.float32, -bound, bound)
        b = jax.random.uniform(kb, (fan_out, 1), jnp.float32, -bound, bound)
        params.append((w, b))
    return params


def mlp_reference(coords, params):
    h = coords
    for i, (w, b) in enumerate(params):
        h = h @ w.T + b.T
        if i < len(params) - 1:
            h = jnp.maximum(h, 0.0)
    return h


if __name__ == "__main__":
    key = jax.random.PRNGKey(0)
    kp, kx = jax.random.split(key)

    params = init_params(kp, HIDDEN)
    # e.g. 256 sampled (x, y, t) coordinates in [-1, 1]
    coords = jax.random.uniform(kx, (256, 3), jnp.float32, -1.0, 1.0)

    out, coords_out = mlp_forward(coords, params)
    out = jax.block_until_ready(out)
    coords_out = jax.block_until_ready(coords_out)

    ref = mlp_reference(coords, params)
    assert out.shape == (256, 1)
    assert coords_out.shape == (256, 3)
    assert jnp.allclose(out, ref, atol=1e-5, rtol=1e-5), "mismatch vs reference"
    assert jnp.array_equal(coords_out, coords)

    print("KERNEL_OK")
</pallas_src>

<mosaic_0001>
module attributes {stable_mosaic.version = 11 : i64} {
  func.func @mlp_kernel(%arg0: i32, %arg1: memref<3x128xf32, #tpu.memory_space<vmem>>, %arg2: memref<32x3xf32, #tpu.memory_space<vmem>>, %arg3: memref<32x1xf32, #tpu.memory_space<vmem>>, %arg4: memref<32x32xf32, #tpu.memory_space<vmem>>, %arg5: memref<32x1xf32, #tpu.memory_space<vmem>>, %arg6: memref<32x32xf32, #tpu.memory_space<vmem>>, %arg7: memref<32x1xf32, #tpu.memory_space<vmem>>, %arg8: memref<1x32xf32, #tpu.memory_space<vmem>>, %arg9: memref<1x1xf32, #tpu.memory_space<vmem>>, %arg10: memref<1x128xf32, #tpu.memory_space<vmem>>) attributes {dimension_semantics = [#tpu.dimension_semantics<parallel>], iteration_bounds = array<i64: 2>, scalar_prefetch = 0 : i64, scratch_operands = 0 : i64, tpu.core_type = #tpu.core_type<tc>, window_params = [{transform_indices = @transform_0, window_bounds = array<i64: 3, 128>}, {pipeline_mode = #tpu.pipeline_mode<synchronous>, transform_indices = @transform_1, window_bounds = array<i64: 32, 3>}, {pipeline_mode = #tpu.pipeline_mode<synchronous>, transform_indices = @transform_2, window_bounds = array<i64: 32, 1>}, {pipeline_mode = #tpu.pipeline_mode<synchronous>, transform_indices = @transform_3, window_bounds = array<i64: 32, 32>}, {pipeline_mode = #tpu.pipeline_mode<synchronous>, transform_indices = @transform_4, window_bounds = array<i64: 32, 1>}, {pipeline_mode = #tpu.pipeline_mode<synchronous>, transform_indices = @transform_5, window_bounds = array<i64: 32, 32>}, {pipeline_mode = #tpu.pipeline_mode<synchronous>, transform_indices = @transform_6, window_bounds = array<i64: 32, 1>}, {pipeline_mode = #tpu.pipeline_mode<synchronous>, transform_indices = @transform_7, window_bounds = array<i64: 1, 32>}, {pipeline_mode = #tpu.pipeline_mode<synchronous>, transform_indices = @transform_8, window_bounds = array<i64: 1, 1>}, {transform_indices = @transform_9, window_bounds = array<i64: 1, 128>}]} {
    %c0 = arith.constant 0 : index
    %c0_0 = arith.constant 0 : index
    %0 = vector.load %arg1[%c0, %c0_0] : memref<3x128xf32, #tpu.memory_space<vmem>>, vector<3x128xf32>
    %c0_1 = arith.constant 0 : index
    %c0_2 = arith.constant 0 : index
    %1 = vector.load %arg2[%c0_1, %c0_2] : memref<32x3xf32, #tpu.memory_space<vmem>>, vector<32x3xf32>
    %cst = arith.constant dense<0.000000e+00> : vector<32x128xf32>
    %2 = tpu.matmul %1, %0, %cst {dimension_numbers = #tpu.dot_dimension_numbers<[1], [0], [0], [1], [0, 0, 1, 1], [], []>} : vector<32x3xf32>, vector<3x128xf32>, vector<32x128xf32> -> vector<32x128xf32>
    %c0_3 = arith.constant 0 : index
    %c0_4 = arith.constant 0 : index
    %3 = vector.load %arg3[%c0_3, %c0_4] : memref<32x1xf32, #tpu.memory_space<vmem>>, vector<32x1xf32>
    %4 = vector.broadcast %3 : vector<32x1xf32> to vector<32x128xf32>
    %5 = arith.addf %2, %4 : vector<32x128xf32>
    %cst_5 = arith.constant 0.000000e+00 : f32
    %6 = vector.broadcast %cst_5 : f32 to vector<32x128xf32>
    %7 = arith.maximumf %5, %6 : vector<32x128xf32>
    %c0_6 = arith.constant 0 : index
    %c0_7 = arith.constant 0 : index
    %8 = vector.load %arg4[%c0_6, %c0_7] : memref<32x32xf32, #tpu.memory_space<vmem>>, vector<32x32xf32>
    %cst_8 = arith.constant dense<0.000000e+00> : vector<32x128xf32>
    %9 = tpu.matmul %8, %7, %cst_8 {dimension_numbers = #tpu.dot_dimension_numbers<[1], [0], [0], [1], [0, 0, 1, 1], [], []>} : vector<32x32xf32>, vector<32x128xf32>, vector<32x128xf32> -> vector<32x128xf32>
    %c0_9 = arith.constant 0 : index
    %c0_10 = arith.constant 0 : index
    %10 = vector.load %arg5[%c0_9, %c0_10] : memref<32x1xf32, #tpu.memory_space<vmem>>, vector<32x1xf32>
    %11 = vector.broadcast %10 : vector<32x1xf32> to vector<32x128xf32>
    %12 = arith.addf %9, %11 : vector<32x128xf32>
    %cst_11 = arith.constant 0.000000e+00 : f32
    %13 = vector.broadcast %cst_11 : f32 to vector<32x128xf32>
    %14 = arith.maximumf %12, %13 : vector<32x128xf32>
    %c0_12 = arith.constant 0 : index
    %c0_13 = arith.constant 0 : index
    %15 = vector.load %arg6[%c0_12, %c0_13] : memref<32x32xf32, #tpu.memory_space<vmem>>, vector<32x32xf32>
    %cst_14 = arith.constant dense<0.000000e+00> : vector<32x128xf32>
    %16 = tpu.matmul %15, %14, %cst_14 {dimension_numbers = #tpu.dot_dimension_numbers<[1], [0], [0], [1], [0, 0, 1, 1], [], []>} : vector<32x32xf32>, vector<32x128xf32>, vector<32x128xf32> -> vector<32x128xf32>
    %c0_15 = arith.constant 0 : index
    %c0_16 = arith.constant 0 : index
    %17 = vector.load %arg7[%c0_15, %c0_16] : memref<32x1xf32, #tpu.memory_space<vmem>>, vector<32x1xf32>
    %18 = vector.broadcast %17 : vector<32x1xf32> to vector<32x128xf32>
    %19 = arith.addf %16, %18 : vector<32x128xf32>
    %cst_17 = arith.constant 0.000000e+00 : f32
    %20 = vector.broadcast %cst_17 : f32 to vector<32x128xf32>
    %21 = arith.maximumf %19, %20 : vector<32x128xf32>
    %c0_18 = arith.constant 0 : index
    %c0_19 = arith.constant 0 : index
    %22 = vector.load %arg8[%c0_18, %c0_19] : memref<1x32xf32, #tpu.memory_space<vmem>>, vector<1x32xf32>
    %cst_20 = arith.constant dense<0.000000e+00> : vector<1x128xf32>
    %23 = tpu.matmul %22, %21, %cst_20 {dimension_numbers = #tpu.dot_dimension_numbers<[1], [0], [0], [1], [0, 0, 1, 1], [], []>} : vector<1x32xf32>, vector<32x128xf32>, vector<1x128xf32> -> vector<1x128xf32>
    %c0_21 = arith.constant 0 : index
    %c0_22 = arith.constant 0 : index
    %24 = vector.load %arg9[%c0_21, %c0_22] : memref<1x1xf32, #tpu.memory_space<vmem>>, vector<1x1xf32>
    %25 = vector.broadcast %24 : vector<1x1xf32> to vector<1x128xf32>
    %26 = arith.addf %23, %25 : vector<1x128xf32>
    %c0_23 = arith.constant 0 : index
    %c0_24 = arith.constant 0 : index
    %27 = vector.load %arg10[%c0_23, %c0_24] : memref<1x128xf32, #tpu.memory_space<vmem>>, vector<1x128xf32>
    tpu.vector_store %arg10[%c0_23, %c0_24], %26 {strides = array<i32>} : memref<1x128xf32, #tpu.memory_space<vmem>>, vector<1x128xf32>,
    return
  }
  func.func @transform_0(%arg0: i32) -> (i32, i32) {
    %c0_i32 = arith.constant 0 : i32
    %c0_i32_0 = arith.constant 0 : i32
    return %c0_i32, %arg0 : i32, i32
  }
  func.func @transform_1(%arg0: i32) -> (i32, i32) {
    %c0_i32 = arith.constant 0 : i32
    %c0_i32_0 = arith.constant 0 : i32
    %c0_i32_1 = arith.constant 0 : i32
    return %c0_i32, %c0_i32_0 : i32, i32
  }
  func.func @transform_2(%arg0: i32) -> (i32, i32) {
    %c0_i32 = arith.constant 0 : i32
    %c0_i32_0 = arith.constant 0 : i32
    %c0_i32_1 = arith.constant 0 : i32
    return %c0_i32, %c0_i32_0 : i32, i32
  }
  func.func @transform_3(%arg0: i32) -> (i32, i32) {
    %c0_i32 = arith.constant 0 : i32
    %c0_i32_0 = arith.constant 0 : i32
    %c0_i32_1 = arith.constant 0 : i32
    return %c0_i32, %c0_i32_0 : i32, i32
  }
  func.func @transform_4(%arg0: i32) -> (i32, i32) {
    %c0_i32 = arith.constant 0 : i32
    %c0_i32_0 = arith.constant 0 : i32
    %c0_i32_1 = arith.constant 0 : i32
    return %c0_i32, %c0_i32_0 : i32, i32
  }
  func.func @transform_5(%arg0: i32) -> (i32, i32) {
    %c0_i32 = arith.constant 0 : i32
    %c0_i32_0 = arith.constant 0 : i32
    %c0_i32_1 = arith.constant 0 : i32
    return %c0_i32, %c0_i32_0 : i32, i32
  }
  func.func @transform_6(%arg0: i32) -> (i32, i32) {
    %c0_i32 = arith.constant 0 : i32
    %c0_i32_0 = arith.constant 0 : i32
    %c0_i32_1 = arith.constant 0 : i32
    return %c0_i32, %c0_i32_0 : i32, i32
  }
  func.func @transform_7(%arg0: i32) -> (i32, i32) {
    %c0_i32 = arith.constant 0 : i32
    %c0_i32_0 = arith.constant 0 : i32
    %c0_i32_1 = arith.constant 0 : i32
    return %c0_i32, %c0_i32_0 : i32, i32
  }
  func.func @transform_8(%arg0: i32) -> (i32, i32) {
    %c0_i32 = arith.constant 0 : i32
    %c0_i32_0 = arith.constant 0 : i32
    %c0_i32_1 = arith.constant 0 : i32
    return %c0_i32, %c0_i32_0 : i32, i32
  }
  func.func @transform_9(%arg0: i32) -> (i32, i32) {
    %c0_i32 = arith.constant 0 : i32
    %c0_i32_0 = arith.constant 0 : i32
    return %c0_i32, %arg0 : i32, i32
  }
}

</mosaic_0001>

<bundles_post_ra>
// kernel: tpu_custom_call.1
= control target key start
LH: loop header
LB: loop body
LE: loop exit
PB: predicated region body
PF: predicated region fallthrough
CT: control target
= control target key end

     0   :  { %s1018_s0 = inlined_call_operand.vmem [shape: f32[3,256], index: 0, kind: input, shape index: {}]   ;;  %s1019_s1 = inlined_call_operand.vmem [shape: f32[32,3], index: 1, kind: input, shape index: {}]   ;;  %s1020_s2 = inlined_call_operand.vmem [shape: f32[32,1], index: 2, kind: input, shape index: {}]   ;;  %s1021_s3 = inlined_call_operand.vmem [shape: f32[32,32], index: 3, kind: input, shape index: {}]   ;;  %s1022_s4 = inlined_call_operand.vmem [shape: f32[32,1], index: 4, kind: input, shape index: {}]   ;;  %s1023_s5 = inlined_call_operand.vmem [shape: f32[32,32], index: 5, kind: input, shape index: {}]   ;;  %s1024_s6 = inlined_call_operand.vmem [shape: f32[32,1], index: 6, kind: input, shape index: {}]   ;;  %s1025_s7 = inlined_call_operand.vmem [shape: f32[1,32], index: 7, kind: input, shape index: {}]   ;;  %s1026_s8 = inlined_call_operand.<no memory space> [shape: f32[1,1], index: 8, kind: input, shape index: {}]   ;;  %s1027_s9 = inlined_call_operand.hbm [shape: f32[1,256], index: 9, kind: output, shape index: {}]  }
   0x1   :  { %v14_v0 = vstv %s1026_s8 }
   0x2   :  { %15 = vst [vmem:[#allocation2] sm:$0x1] %v14_v0 }
   0x3   :  { %16 = vsyncpa [#allocation4], 0 }
   0x4   :  { %18 = vsyncpa [#allocation4 + $0x1], 0  ;;  %s845_s11 = smov 0   ;;  %s847_s12 = smov 0  }
   0x5   :  { %s849_s13 = smov 0   ;;  %s851_s14 = smov 0  }
   0x6 LB: > { %s866_s8 = sadd.s32 4294967295, %s789_s14   ;;  %s655_s15 = sadd.s32 4294967294, %s789_s14   ;;  %s789_s14 = sphi %s851_s14, %s1033_s14   ;;  %s785_s13 = sphi %s849_s13, %s1032_s13   ;;  %s781_s12 = sphi %s847_s12, %s1031_s12   ;;  %s777_s11 = sphi %s845_s11, %s1030_s11  }
   0x7   : > { %s870_s16 = sadd.s32 1, %s789_s14   ;;  %s225_s17 = sadd.s32 1, %s785_s13 }
   0x8   : > { %s222_s18 = ssub.s32 %s789_s14, %s870_s16  ;;  %p235_p0 = scmp.ne.s32.totalorder %s785_s13, %s781_s12 }
   0x9   : > { %p223_p1 = scmp.eq.s32.totalorder %s222_s18, 0  ;;  %p236_p2 = scmp.eq.s32.totalorder %s866_s8, 1 }
   0xa   : > { %p241_p3 = scmp.ne.s32.totalorder %s781_s12, %s777_s11  ;;  %p242_p4 = scmp.eq.s32.totalorder %s655_s15, 1 }
   0xb   : > { %s881_s19 = scalar_select %p223_p1, %s785_s13, %s225_s17  }
   0xc   : > { %p883_p5 = por %p236_p2, %p235_p0  ;;  %p887_p6 = por %p242_p4, %p241_p3 }
   0xd   : > { %p658_p7 = scmp.ge.s32.totalorder %s789_s14, 1  ;;  %p291_p8 = scmp.lt.s32.totalorder %s789_s14, 3 }
   0xf   : > { %p292_p9 = pnand %p658_p7, %p291_p8 }
  0x10   : > { %p325_p10 = scmp.lt.s32.totalorder (!%p292_p9), %s866_s8, 1  ;;  %s323_s25 = sand.u32 (!%p292_p9), 1, %s781_s12  }
  0x11   : > { %295 = sbr.rel (%p292_p9) target bundleno = 634 (0x27a), region = 56  ;;  %s596_s28 = scalar_lea.hbm (!%p292_p9), %s1027_s9, %s866_s8 }
  0x12   : > { %s324_s29 = scalar_lea.vmem (!%p292_p9), [#allocation3], %s323_s25  ;;  %s600_s10 = sshll.u32 (!%p292_p9), %s596_s28, 4  ;;  %s601_s10 = int_to_ptr.hbm [resolvable:$true] %s600_s10 }
  0x13   : > { %s588_s15 = scalar_lea.sflag (!%p292_p9), [#allocation4], %s323_s25  ;;  %s741_s17 = sshra.s32 (!%p292_p9), %s601_s10, 4  ;;  %s742_s17 = int_to_ptr.hbm [resolvable:$true] %s741_s17 }
  0x14   : > { %s743_s18 = scalar_lea.hbm (!%p292_p9), %s742_s17, 1  ;;  %s747_s23 = scalar_lea.hbm (!%p292_p9), %s1027_s9, 2 }
  0x15   : > { %p744_p11 = scmp.ne.s32.totalorder (!%p292_p9), %s742_s17, %s743_s18  ;;  %p748_p0 = scmp.lt.s32.totalorder (!%p292_p9), %s742_s17, %s1027_s9 }
  0x16   : > { %v337_v1 = vld [vmem:[%s1020_s2 + $0x18] sm:$0xff]  ;;  %v791_v2 = vmov 0   ;;  %v335_v3 = vld [vmem:[%s1020_s2 + $0x8] sm:$0xff]  ;;  %s326_s26 = scalar_select %p325_p10, %s866_s8, 1  ;;  %vm371_vm0 = vcmask 1042432   ;;  %v330_v4 = vld [vmem:[%s1019_s1] sm:$0xff] }
  0x17   : > { %724 = vset.pattern.permute.xlu0 %v791_v2  ;;  %725 = vset.pattern.permute.xlu1 %v791_v2  ;;  %vm358_vm1 = vcmask 23552   ;;  %v336_v6 = vld [vmem:[%s1020_s2 + $0x10] sm:$0xff]  ;;  %v334_v7 = vld [vmem:[%s1020_s2] sm:$0xff]  ;;  %v331_v8 = vld [vmem:[%s1019_s1 + $0x8] sm:$0xff]  ;;  %vm436_vm2 = vcmask 261120   ;;  %p745_p12 = pnand %p744_p11, %p883_p5  ;;  %p749_p1 = scmp.lt.s32.totalorder %s747_s23, %s743_s18 }
  0x18   : > { %355 = vperm.xlu0 %724, %v337_v1   ;;  %345 = vperm.xlu1 %725, %v335_v3   ;;  %s659_s27 = sshll.u32 %s326_s26, 2  ;;  %v413_v9 = vld [vmem:[%s1022_s4 + $0x8] sm:$0xff]  ;;  %v412_v10 = vld [vmem:[%s1022_s4] sm:$0xff]  ;;  %v332_v11 = vld [vmem:[%s1019_s1 + $0x10] sm:$0xff] }
  0x19   : > { %726 = vset.pattern.permute.xlu2 %v791_v2  ;;  %s328_s30 = scalar_lea.vmem %s1018_s0, %s659_s27  ;;  %v488_v12 = vld [vmem:[%s1024_s6 + $0x10] sm:$0xff]  ;;  %v487_v13 = vld [vmem:[%s1024_s6 + $0x8] sm:$0xff]  ;;  %v333_v14 = vld [vmem:[%s1019_s1 + $0x18] sm:$0xff]  ;;  %p746_p13 = pneg %p745_p12 }
  0x1a   : > { %v329_v5 = vld [vmem:[%s328_s30] sm:$0x7]  ;;  %v415_v21 = vld [vmem:[%s1022_s4 + $0x18] sm:$0xff]  ;;  %v414_v29 = vld [vmem:[%s1022_s4 + $0x10] sm:$0xff]  ;;  %s598_s30 = sshll.u32 %s324_s29, 4  ;;  %p750_p2 = por %p749_p1, %p748_p0  ;;  %s599_s30 = int_to_ptr.vmem [resolvable:$true] %s598_s30 }
  0x1b   : > { %660 = vmatpush.msk.msra.mxu0 %vm371_vm0, %v329_v5  ;;  %v556_v15 = vld [vmem:[#allocation2] sm:$0x1]  ;;  %433 = vperm.xlu2 %726, %v415_v21   ;;  %v411_v35 = vld [vmem:[%s1021_s3 + $0x18] sm:$0xff]  ;;  %v409_v37 = vld [vmem:[%s1021_s3 + $0x8] sm:$0xff] }
  0x1c   : > { %661 = vmatmul.msk.f32.vlgmr.msra.gmra.mxu0 %vm358_vm1, %v330_v4  ;;  %v408_v34 = vld [vmem:[%s1021_s3] sm:$0xff]  ;;  %v489_v36 = vld [vmem:[%s1024_s6 + $0x18] sm:$0xff]  ;;  %v410_v39 = vld [vmem:[%s1021_s3 + $0x10] sm:$0xff]  ;;  %p751_p3 = pnand %p750_p2, %p746_p13 }
  0x1d   : > { %v486_v38 = vld [vmem:[%s1024_s6] sm:$0xff]  ;;  %v485_v57 = vld [vmem:[%s1023_s5 + $0x18] sm:$0xff]  ;;  %v483_v58 = vld [vmem:[%s1023_s5 + $0x8] sm:$0xff] }
  0x1e   : > { %v482_v56 = vld [vmem:[%s1023_s5] sm:$0xff]  ;;  %v484_v59 = vld [vmem:[%s1023_s5 + $0x10] sm:$0xff] }
  0x20   : > { %350 = vperm.xlu0 %724, %v336_v6   ;;  %340 = vperm.xlu1 %725, %v334_v7  }
  0x23   : > { %428 = vperm.xlu2 %726, %v414_v29  }
  0x24   : > { %662 = vmatmul.msk.f32.gmra.mxu0 %vm358_vm1, %v331_v8 }
  0x28   : > { %423 = vperm.xlu0 %724, %v413_v9   ;;  %418 = vperm.xlu1 %725, %v412_v10  }
  0x2b   : > { %507 = vperm.xlu2 %726, %v489_v36  }
  0x2c   : > { %663 = vmatmul.msk.f32.gmra.mxu0 %vm358_vm1, %v332_v11 }
  0x30   : > { %502 = vperm.xlu0 %724, %v488_v12   ;;  %497 = vperm.xlu1 %725, %v487_v13   ;;  %v555_v12 = vld [vmem:[%s1025_s7] sm:$0x1] }
  0x33   : > { %492 = vperm.xlu2 %726, %v486_v38  }
  0x34   : > { %664 = vmatmul.msk.f32.gmra.mxu0 %vm358_vm1, %v333_v14 }
  0x38   : > { %559 = vperm.xlu0 %724, %v556_v15  }
  0x75   : > { %v434_v41 = vpop.permute.xlu2 %433 }
  0x7d   : > { %v429_v47 = vpop.permute.xlu2 %428 }
  0x85   : > { %v508_v60 = vpop.permute.xlu2 %507 }
  0x8a   : > { %v356_v18 = vpop.permute.xlu0 %355  ;;  %v346_v19 = vpop.permute.xlu1 %345 }
  0x8d   : > { %v493_v7 = vpop.permute.xlu2 %492 }
  0x92   : > { %v351_v22 = vpop.permute.xlu0 %350  ;;  %v341_v26 = vpop.permute.xlu1 %340 }
  0x99   : > { %v392_v16 = vpop.f32.mrf.mxu0 }
  0x9a   : > { %v393_v30 = vadd.f32 %v392_v16, %v341_v26  ;;  %v424_v46 = vpop.permute.xlu0 %423  ;;  %v419_v51 = vpop.permute.xlu1 %418 }
  0x9c   : > { %v404_v33 = vmax.f32 %v393_v30, 0.0 }
  0xa1   : > { %v395_v17 = vpop.f32.mrf.mxu0 }
  0xa2   : > { %v396_v27 = vadd.f32 %v395_v17, %v346_v19  ;;  %v503_v2 = vpop.permute.xlu0 %502  ;;  %v498_v3 = vpop.permute.xlu1 %497 }
  0xa4   : > { %v405_v32 = vmax.f32 %v396_v27, 0.0 }
  0xa9   : > { %v398_v20 = vpop.f32.mrf.mxu0 }
  0xaa   : > { %v399_v24 = vadd.f32 %v398_v20, %v351_v22  ;;  %v560_v13 = vpop.permute.xlu0 %559 }
  0xab   : > { %v562_v14 = vperm.slane %v560_v13, 0 }
  0xac   : > { %v406_v31 = vmax.f32 %v399_v24, 0.0 }
  0xb1   : > { %v401_v23 = vpop.f32.mrf.mxu0 }
  0xb2   : > { %v402_v25 = vadd.f32 %v401_v23, %v356_v18 }
  0xb4   : > { %v407_v28 = vmax.f32 %v402_v25, 0.0 }
  0xb6   : > { %461 = vmatpush.msra.mxu1 %v407_v28  ;;  %676 = vmatpush.msra.mxu3 %v407_v28 }
  0xb8   : > { %462 = vmatpush.msra.mxu1 %v406_v31  ;;  %677 = vmatpush.msra.mxu3 %v406_v31 }
  0xba   : > { %463 = vmatpush.msra.mxu1 %v405_v32  ;;  %678 = vmatpush.msra.mxu3 %v405_v32 }
  0xbc   : > { %464 = vmatpush.msra.mxu1 %v404_v33  ;;  %679 = vmatpush.msra.mxu3 %v404_v33 }
  0xbd   : > { %665 = vmatmul.msk.f32.vlgmr.msra.gmra.mxu1 %vm436_vm2, %v408_v34  ;;  %668 = vmatmul.msk.f32.vlgmr.msra.gmra.mxu3 %vm436_vm2, %v411_v35 }
  0xc5   : > { %666 = vmatmul.msk.f32.gmra.mxu1 %vm436_vm2, %v409_v37 }
  0xcd   : > { %667 = vmatmul.msk.f32.gmra.mxu1 %vm436_vm2, %v410_v39 }
 0x13a   : > { %v466_v40 = vpop.f32.mrf.mxu1 }
 0x13b   : > { %v467_v52 = vadd.f32 %v466_v40, %v419_v51 }
 0x13d   : > { %v478_v55 = vmax.f32 %v467_v52, 0.0 }
 0x140   : > { %v475_v42 = vpop.f32.mrf.mxu3 }
 0x141   : > { %v476_v43 = vadd.f32 %v475_v42, %v434_v41 }
 0x142   : > { %v469_v44 = vpop.f32.mrf.mxu1 }
 0x143   : > { %v481_v45 = vmax.f32 %v476_v43, 0.0  ;;  %v470_v49 = vadd.f32 %v469_v44, %v424_v46 }
 0x145   : > { %534 = vmatpush.msra.mxu2 %v481_v45  ;;  %680 = vmatpush.msrb.mxu3 %v481_v45  ;;  %v479_v54 = vmax.f32 %v470_v49, 0.0 }
 0x14a   : > { %v472_v48 = vpop.f32.mrf.mxu1 }
 0x14b   : > { %v473_v50 = vadd.f32 %v472_v48, %v429_v47 }
 0x14d   : > { %v480_v53 = vmax.f32 %v473_v50, 0.0 }
 0x14f   : > { %535 = vmatpush.msra.mxu2 %v480_v53  ;;  %681 = vmatpush.msrb.mxu3 %v480_v53 }
 0x151   : > { %536 = vmatpush.msra.mxu2 %v479_v54  ;;  %682 = vmatpush.msrb.mxu3 %v479_v54 }
 0x153   : > { %537 = vmatpush.msra.mxu2 %v478_v55  ;;  %683 = vmatpush.msrb.mxu3 %v478_v55 }
 0x154   : > { %669 = vmatmul.msk.f32.vlgmr.msra.gmra.mxu2 %vm436_vm2, %v482_v56  ;;  %672 = vmatmul.msk.f32.vlgmr.msrb.gmra.mxu3 %vm436_vm2, %v485_v57 }
 0x15c   : > { %670 = vmatmul.msk.f32.gmra.mxu2 %vm436_vm2, %v483_v58 }
 0x164   : > { %671 = vmatmul.msk.f32.gmra.mxu2 %vm436_vm2, %v484_v59 }
 0x1d7   : > { %v539_v61 = vpop.f32.mrf.mxu2  ;;  %v548_v62 = vpop.f32.mrf.mxu3 }
 0x1d8   : > { %v549_v63 = vadd.f32 %v548_v62, %v508_v60  ;;  %v540_v8 = vadd.f32 %v539_v61, %v493_v7 }
 0x1da   : > { %v554_v0 = vmax.f32 %v549_v63, 0.0  ;;  %v551_v11 = vmax.f32 %v540_v8, 0.0 }
 0x1dc   : > { %578 = vmatpush.msra.mxu3 %v554_v0 }
 0x1df   : > { %v542_v1 = vpop.f32.mrf.mxu2 }
 0x1e0   : > { %v543_v5 = vadd.f32 %v542_v1, %v498_v3 }
 0x1e2   : > { %v552_v10 = vmax.f32 %v543_v5, 0.0 }
 0x1e7   : > { %v545_v4 = vpop.f32.mrf.mxu2 }
 0x1e8   : > { %v546_v6 = vadd.f32 %v545_v4, %v503_v2 }
 0x1ea   : > { %v553_v9 = vmax.f32 %v546_v6, 0.0 }
 0x1ec   : > { %579 = vmatpush.msra.mxu3 %v553_v9 }
 0x1ee   : > { %580 = vmatpush.msra.mxu3 %v552_v10 }
 0x1f0   : > { %581 = vmatpush.msra.mxu3 %v551_v11 }
 0x1f1   : > { %673 = vmatmul.msk.f32.vlgmr.msra.gmra.mxu3 %vm436_vm2, %v555_v12 }
 0x274   : > { %v583_v15 = vpop.f32.mrf.mxu3 }
 0x275   : > { %v584_v16 = vadd.f32 %v583_v15, %v562_v14 }
 0x277   : > { %586 = vst [vmem:[%s324_s29] sm:$0x1] %v584_v16 }
 0x278   : > { %754 = shalt.err (!%p751_p3)
}
 0x279   : > { %684 = dma.vmem_to_hbm [thread:$0]  (%p883_p5), %s599_s30, 16, %s601_s10, %s588_s15  }
 0x27a PF: > { %p690_p4 = scmp.ge.s32.totalorder %s789_s14, 2  ;;  %s612_s25 = sand.u32 1, %s777_s11  }
 0x27b   : > { %s613_s27 = scalar_lea.sflag [#allocation4], %s612_s25 }
 0x27c   : > { %p687_p7 = pnand %p690_p4, %p887_p6 }
 0x27e   : > { %p688_p8 = pneg %p687_p7 }
 0x280   : > { %772 = dma.done.wait (%p688_p8), %s613_s27, 16  }
 0x281   : > { %774 = vsyncadd (%p688_p8), %s613_s27, 4294967280  ;;  %p21_p9 = scmp.ge.s32.totalorder %s870_s16, 4   ;;  %s1030_s11 = smov %s781_s12 }
 0x282   : > { %s1031_s12 = smov %s785_s13  ;;  %s1032_s13 = smov %s881_s19 }
 0x283   : > { %s1033_s14 = smov %s870_s16  ;;  %23 = sbr.rel (!%p21_p9) target bundleno = 6 (0x6), region = 91 }
 0x288   :  { %618 = vsyncpa [#allocation4], 1 }
 0x289   :  { %620 = vsyncpa [#allocation4 + $0x1], 1 }

</bundles_post_ra>
